<compile_context>
chip_gen: v7x
topology: tpu7x:2x2x1
jax: 0.10.0
libtpu: 0.0.40
codegen_flags: <defaults>
</compile_context>

<pallas_src>
import functools

import jax
import jax.numpy as jnp
from jax.experimental import pallas as pl
from jax.experimental.pallas import tpu as pltpu

LANES = 128
SUBLANES = 8


# ---------------------------------------------------------------------------
# Kernel
# ---------------------------------------------------------------------------
def _activation_kernel(x_ref, o_ref, *, act_name):
    x = x_ref[...]
    if act_name == "relu":
        o_ref[...] = jnp.maximum(x, jnp.zeros((), dtype=x.dtype))
    elif act_name == "gelu":
        # tanh-approx GELU (== torch.nn.GELU(approximate="tanh")).
        # Compute in f32, cast once at the end (parity with the f32 reference;
        # v5e has no bf16 VPU/EUP so bf16 "native" compute buys nothing).
        xf = x.astype(jnp.float32)
        inner = 0.7978845608028654 * (xf + 0.044715 * (xf * xf * xf))
        y = 0.5 * xf * (1.0 + jnp.tanh(inner))
        o_ref[...] = y.astype(o_ref.dtype)
    else:
        # TODO(synk): arbitrary user-supplied `activation` callables (the
        # nn.Module constructor accepts any) are not translated; add branches
        # here as needed.
        raise ValueError(f"unsupported activation: {act_name}")


def _jnp_activation(x, act_name):
    """Single-pass fused XLA fallback (tiny or lane-unaligned inputs)."""
    if act_name == "relu":
        return jnp.maximum(x, jnp.zeros((), dtype=x.dtype))
    if act_name == "gelu":
        return jax.nn.gelu(x.astype(jnp.float32), approximate=True).astype(x.dtype)
    raise ValueError(f"unsupported activation: {act_name}")


# ---------------------------------------------------------------------------
# Per-generation tiling parameters
# ---------------------------------------------------------------------------
@functools.lru_cache(maxsize=None)
def _chip_params():
    """Returns (block_bytes, vmem_limit_bytes or None) keyed by TPU generation."""
    try:
        kind = jax.devices()[0].device_kind.lower()
    except Exception:  # pragma: no cover - defensive; default is conservative
        kind = ""
    if "v7" in kind or "7x" in kind:
        # 6 MiB tiles -> 24 MiB double-buffered in+out; raise scoped VMEM for
        # headroom (physical is 64 MiB per TC on v7x).
        return 6 * 1024 * 1024, 40 * 1024 * 1024
    if "v6" in kind:
        # 24 MiB double-buffered fits the 32 MiB default scoped VMEM.
        return 6 * 1024 * 1024, None
    if "v5p" in kind or "v4" in kind:
        return 4 * 1024 * 1024, None
    if "v5" in kind:
        # v5e default scoped VMEM is only 16 MiB -> keep 4*tile <= 12 MiB.
        return 3 * 1024 * 1024, None
    return 2 * 1024 * 1024, None


def _round_up(n, m):
    return (n + m - 1) // m * m


def _choose_tile_rows(rows, itemsize, block_bytes):
    """Row-tile from the byte budget; guarantee >=2 grid steps when possible."""
    tr = max(SUBLANES, (block_bytes // (LANES * itemsize)) // SUBLANES * SUBLANES)
    if rows <= tr:
        if rows >= 2 * SUBLANES:
            # Split into (at least) two blocks so v7x's two TensorCores both
            # get work under dimension_semantics=("parallel",).
            tr = _round_up(pl.cdiv(rows, 2), SUBLANES)
        else:
            tr = SUBLANES
    return tr


# ---------------------------------------------------------------------------
# Pallas launch over a lane-dense (rows, 128) slab
# ---------------------------------------------------------------------------
def _pallas_activation_2d(x2d, act_name, tile_rows, vmem_limit_bytes, in_place):
    rows, lanes = x2d.shape
    grid = (pl.cdiv(rows, tile_rows),)  # partial last block is masked by Pallas
    cp_kwargs = dict(dimension_semantics=("parallel",))
    if vmem_limit_bytes is not None:
        cp_kwargs["vmem_limit_bytes"] = vmem_limit_bytes
    return pl.pallas_call(
        functools.partial(_activation_kernel, act_name=act_name),
        out_shape=jax.ShapeDtypeStruct((rows, lanes), x2d.dtype),
        grid_spec=pltpu.PrefetchScalarGridSpec(
            num_scalar_prefetch=0,
            grid=grid,
            in_specs=[pl.BlockSpec((tile_rows, lanes), lambda i: (i, 0))],
            out_specs=pl.BlockSpec((tile_rows, lanes), lambda i: (i, 0)),
        ),
        input_output_aliases=({0: 0} if in_place else {}),
        compiler_params=pltpu.CompilerParams(**cp_kwargs),
    )(x2d)


# ---------------------------------------------------------------------------
# Wrapper (flatten lane-dense -> tile -> reshape back; no pad, no slice)
# ---------------------------------------------------------------------------
@functools.partial(
    jax.jit,
    static_argnames=("act_name", "min_pallas_elements", "in_place", "block_bytes"),
)
def activation_module(
    x,
    act_name="relu",
    min_pallas_elements=64 * 1024,  # tiny tensors: fused XLA is faster
    in_place=False,                 # alias output onto input HBM buffer
    block_bytes=None,               # None -> per-generation default
):
    """Pallas equivalent of ActivationModule(activation)(x)."""
    orig_shape = x.shape
    n = x.size

    # Tiny or lane-unaligned inputs: a single fused XLA elementwise pass is
    # already at the HBM roofline (1x read + 1x write) and avoids any
    # pad/slice extra passes around a custom call.
    if n < max(min_pallas_elements, SUBLANES * LANES) or (n % LANES != 0):
        return _jnp_activation(x, act_name)

    chip_block_bytes, vmem_limit_bytes = _chip_params()
    if block_bytes is None:
        block_bytes = chip_block_bytes

    rows = n // LANES
    itemsize = jnp.dtype(x.dtype).itemsize
    tile_rows = _choose_tile_rows(rows, itemsize, block_bytes)

    # Layout-preserving reshape (free); rows need not be a multiple of 8 —
    # the block shape is (8k, 128) and Pallas masks the partial last block.
    out2d = _pallas_activation_2d(
        x.reshape(rows, LANES), act_name, tile_rows, vmem_limit_bytes, in_place
    )
    return out2d.reshape(orig_shape)


# ---------------------------------------------------------------------------
# Main
# ---------------------------------------------------------------------------
if __name__ == "__main__":
    # NCHW activation, as a ResNet block would produce.
    x = jax.random.normal(jax.random.PRNGKey(0), (2, 4, 16, 16), dtype=jnp.float32)

    # ActivationModule(nn.ReLU()) equivalent. Force the Pallas path even for
    # this small demo input (min_pallas_elements=0).
    y = jax.block_until_ready(
        activation_module(x, act_name="relu", min_pallas_elements=0)
    )
    assert y.shape == x.shape and y.dtype == x.dtype
    assert jnp.array_equal(y, jnp.maximum(x, 0.0))

    # Same call with in-place output aliasing (correct whether or not the
    # caller donates x; XLA inserts a defensive copy when it cannot alias).
    y_ip = jax.block_until_ready(
        activation_module(x, act_name="relu", min_pallas_elements=0, in_place=True)
    )
    assert jnp.array_equal(y_ip, jnp.maximum(x, 0.0))

    # ActivationModule(nn.GELU(approximate="tanh")) equivalent, same kernel.
    y_gelu = jax.block_until_ready(
        activation_module(x, act_name="gelu", min_pallas_elements=0)
    )
    assert jnp.allclose(y_gelu, jax.nn.gelu(x, approximate=True), atol=1e-5, rtol=1e-5)

    # Element count is a multiple of 128 lanes but rows (=10) is not a multiple
    # of 8: exercises the masked partial last block (no pad, no slice).
    x_part = jax.random.normal(jax.random.PRNGKey(1), (5, 4, 8, 8), dtype=jnp.float32)
    y_part = jax.block_until_ready(
        activation_module(x_part, act_name="relu", min_pallas_elements=0)
    )
    assert y_part.shape == x_part.shape
    assert jnp.array_equal(y_part, jnp.maximum(x_part, 0.0))

    # Lane-unaligned element count: routed to the single-pass fused XLA path
    # (previously pad + kernel + slice, ~3x HBM traffic).
    x_odd = jax.random.normal(jax.random.PRNGKey(2), (3, 5, 7, 11), dtype=jnp.float32)
    y_odd = jax.block_until_ready(
        activation_module(x_odd, act_name="relu", min_pallas_elements=0)
    )
    assert y_odd.shape == x_odd.shape
    assert jnp.array_equal(y_odd, jnp.maximum(x_odd, 0.0))

    # Larger lane-aligned bf16 input: big-tile Pallas path (default thresholds),
    # f32 GELU compute with a single final cast to bf16.
    x_big = jax.random.normal(jax.random.PRNGKey(3), (2, 64, 32, 32), dtype=jnp.bfloat16)
    y_big = jax.block_until_ready(activation_module(x_big, act_name="gelu"))
    ref_big = jax.nn.gelu(x_big.astype(jnp.float32), approximate=True)
    assert y_big.dtype == x_big.dtype
    assert jnp.allclose(y_big.astype(jnp.float32), ref_big, atol=3e-2, rtol=3e-2)

    print("KERNEL_OK")
</pallas_src>

<mosaic_0001>
module attributes {stable_mosaic.version = 11 : i64} {
  func.func @_activation_kernel(%arg0: i32, %arg1: memref<8x128xf32, #tpu.memory_space<vmem>>, %arg2: memref<8x128xf32, #tpu.memory_space<vmem>>) attributes {dimension_semantics = [#tpu.dimension_semantics<parallel>], iteration_bounds = array<i64: 2>, scalar_prefetch = 0 : i64, scratch_operands = 0 : i64, tpu.core_type = #tpu.core_type<tc>, window_params = [{transform_indices = @transform_0, window_bounds = array<i64: 8, 128>}, {transform_indices = @transform_1, window_bounds = array<i64: 8, 128>}]} {
    %c0 = arith.constant 0 : index
    %c0_0 = arith.constant 0 : index
    %0 = vector.load %arg1[%c0, %c0_0] : memref<8x128xf32, #tpu.memory_space<vmem>>, vector<8x128xf32>
    %cst = arith.constant 0.000000e+00 : f32
    %1 = vector.broadcast %cst : f32 to vector<8x128xf32>
    %2 = arith.maximumf %0, %1 : vector<8x128xf32>
    %c0_1 = arith.constant 0 : index
    %c0_2 = arith.constant 0 : index
    %3 = vector.load %arg2[%c0_1, %c0_2] : memref<8x128xf32, #tpu.memory_space<vmem>>, vector<8x128xf32>
    tpu.vector_store %arg2[%c0_1, %c0_2], %2 {strides = array<i32>} : memref<8x128xf32, #tpu.memory_space<vmem>>, vector<8x128xf32>,
    return
  }
  func.func @transform_0(%arg0: i32) -> (i32, i32) {
    %c0_i32 = arith.constant 0 : i32
    %c0_i32_0 = arith.constant 0 : i32
    return %arg0, %c0_i32 : i32, i32
  }
  func.func @transform_1(%arg0: i32) -> (i32, i32) {
    %c0_i32 = arith.constant 0 : i32
    %c0_i32_0 = arith.constant 0 : i32
    return %arg0, %c0_i32 : i32, i32
  }
}

</mosaic_0001>

<bundles_post_ra>
// kernel: activation_module.1
= control target key start
LH: loop header
LB: loop body
LE: loop exit
PB: predicated region body
PF: predicated region fallthrough
CT: control target
= control target key end

     0   :  { %s189_s6 = smov 0   ;;  %s209_s0 = inlined_call_operand.vmem [shape: f32[16,128], index: 0, kind: input, shape index: {}]   ;;  %s210_s1 = inlined_call_operand.vmem [shape: f32[16,128], index: 1, kind: output, shape index: {}]  }
   0x1 LB: > { %s168_s7 = sadd.s32 4294967295, %s191_s6   ;;  %p172_p0 = scmp.ge.s32.totalorder %s191_s6, 1  ;;  %s191_s6 = sphi %s189_s6, %s11_s6  }
   0x2   : > { %p86_p1 = scmp.lt.s32.totalorder %s191_s6, 3 }
   0x4   : > { %p87_p2 = pnand %p172_p0, %p86_p1 }
   0x5   : > { %p104_p3 = scmp.lt.s32.totalorder (!%p87_p2), %s168_s7, 1 }
   0x6   : > { %90 = sbr.rel (%p87_p2) target bundleno = 20 (0x14), region = 24 }
   0xd   : > { %s212_s7 = smov (!%p104_p3, %s168_s7), 1 }
   0xe   : > { %s173_s8 = sshll.u32 %s212_s7, 3 }
   0xf   : > { %s107_s11 = scalar_lea.vmem %s209_s0, %s173_s8  ;;  %s111_s14 = scalar_lea.vmem %s210_s1, %s173_s8 }
  0x10   : > { %v112_v0 = vld [vmem:[%s107_s11] sm:$0xff] }
  0x11   : > { %v113_v1 = vmax.f32 %v112_v0, 0.0 }
  0x13   : > { %114 = vst [vmem:[%s111_s14] sm:$0xff] %v113_v1 }
  0x14 PF: > { %s11_s6 = sadd.s32 1, %s191_s6  }
  0x15   : > { %p8_p4 = scmp.ge.s32.totalorder %s11_s6, 4  }
  0x17   :  { %10 = sbr.rel (!%p8_p4) target bundleno = 1 (0x1), region = 54 }

</bundles_post_ra>
